<compile_context>
chip_gen: v7x
topology: tpu7x:2x2x1
jax: 0.10.0
libtpu: 0.0.40
codegen_flags: <defaults>
</compile_context>

<pallas_src>
import functools

import jax
import jax.numpy as jnp
from jax.experimental import pallas as pl
from jax.experimental.pallas import tpu as pltpu

BN_EPS = 1e-5
MXU_DTYPE = jnp.bfloat16  # matmul operand dtype; accumulation stays f32
# use the in-kernel one-hot-matmul upsample only while the gather matrix fits
_UPSAMPLE_MATRIX_BYTES_MAX = 4 << 20


# ------------------------------ in-kernel helpers ---------------------------


def _roll2d(x, s0, s1):
    """Circular roll of a (H, W, C) value along H (axis 0) and W (axis 1)."""
    h, w = x.shape[0], x.shape[1]
    s0 %= h
    s1 %= w
    if s0:
        x = jnp.concatenate([x[h - s0:], x[:h - s0]], axis=0)
    if s1:
        x = jnp.concatenate([x[:, w - s1:], x[:, :w - s1]], axis=1)
    return x


def _circular_conv(pre, w_ref, b_ref, k, d):
    """KxK circular 'same' conv (dilation d) as ONE matmul with K = k*k*Ci.

    pre:   (H, W, Ci) f32 pre-activation (VMEM value).
    w_ref: (k*k*Ci, Co) bf16 weight ref (tap-major, channel-minor rows).
    b_ref: (1, Co) f32 bias ref.
    """
    h, w, ci = pre.shape
    p = (k // 2) * d
    taps = [_roll2d(pre, p - kh * d, p - kw * d)
            for kh in range(k) for kw in range(k)]
    lhs = jnp.concatenate(taps, axis=-1) if len(taps) > 1 else taps[0]
    lhs = lhs.reshape(h * w, k * k * ci)
    out = jnp.dot(lhs.astype(MXU_DTYPE), w_ref[...],
                  preferred_element_type=jnp.float32) + b_ref[...]
    return out.reshape(h, w, out.shape[-1])


def _preres_block_body(x, refs, k, d, has_skip):
    """One PreResBlock on a VMEM-resident (H, W, Cin) value; returns value."""
    if has_skip:
        (s1, t1, w1, b1, s2, t2, w2, b2, wo, bo, ws, bs) = refs
    else:
        (s1, t1, w1, b1, s2, t2, w2, b2, wo, bo) = refs

    h, w, cin = x.shape

    # BN1(eval) + ReLU applied exactly once, then circular conv1 (one matmul).
    pre1 = jnp.maximum(x * s1[...] + t1[...], 0.0)
    f1 = _circular_conv(pre1, w1, b1, k, d)          # (H, W, med)

    # BN2(eval) + ReLU, then circular conv2 (one matmul).
    pre2 = jnp.maximum(f1 * s2[...] + t2[...], 0.0)
    f2 = _circular_conv(pre2, w2, b2, k, d)          # (H, W, med)

    # outconv (1x1) + skip path + residual add, fused.
    hw = h * w
    out = jnp.dot(f2.reshape(hw, f2.shape[-1]).astype(MXU_DTYPE), wo[...],
                  preferred_element_type=jnp.float32) + bo[...]
    if has_skip:
        out = out + jnp.dot(x.reshape(hw, cin).astype(MXU_DTYPE), ws[...],
                            preferred_element_type=jnp.float32) + bs[...]
    else:
        out = out + x.reshape(hw, cin)
    return out.reshape(h, w, out.shape[-1])


# --------------------------------- kernels ----------------------------------


def _scale_level_kernel(*refs, k, d, block_skips, fused_upsample):
    """Fused decoder level: upsample2x + skip concat + whole ScaleBlock."""
    if fused_upsample:
        xl_ref, xs_ref, p_ref = refs[:3]
        rest = refs[3:]
    else:
        xl_ref, xs_ref = refs[:2]
        rest = refs[2:]
    param_refs, o_ref = rest[:-1], rest[-1]

    xs = xs_ref[0]                                    # (2H, 2W, Cs) f32
    h2, w2 = xs.shape[0], xs.shape[1]

    if fused_upsample:
        xl = xl_ref[0]                                # (H, W, Cl)
        h, w, cl = xl.shape
        # nearest-2x upsample as a one-hot gather matmul on the MXU.
        xu = jnp.dot(p_ref[...], xl.reshape(h * w, cl).astype(MXU_DTYPE),
                     preferred_element_type=jnp.float32)
        xu = xu.reshape(h2, w2, cl)
    else:
        xu = xl_ref[0]                                # already (2H, 2W, Cl)

    x = jnp.concatenate([xu, xs], axis=-1)            # channel concat in VMEM

    idx = 0
    for has_skip in block_skips:
        nparam = 12 if has_skip else 10
        x = _preres_block_body(x, param_refs[idx:idx + nparam], k, d, has_skip)
        idx += nparam
    o_ref[0] = x


def _latent_locked_kernel(x_ref, w_ref, b_ref, o_ref, *, cl):
    # one matmul for [mean | log_std]; locked latent == means
    ms = jnp.dot(x_ref[...].astype(MXU_DTYPE), w_ref[...],
                 preferred_element_type=jnp.float32) + b_ref[...]
    means = ms[:, :cl]
    stds = jnp.exp(ms[:, cl:])
    o_ref[...] = jnp.concatenate([means, stds, means], axis=-1)


def _latent_sample_kernel(x_ref, eps_ref, w_ref, b_ref, o_ref, *, cl):
    ms = jnp.dot(x_ref[...].astype(MXU_DTYPE), w_ref[...],
                 preferred_element_type=jnp.float32) + b_ref[...]
    means = ms[:, :cl]
    stds = jnp.exp(ms[:, cl:])
    o_ref[...] = jnp.concatenate([means, stds, eps_ref[...] * stds + means],
                                 axis=-1)


# ----------------------------- kernel wrappers -------------------------------


def _const_spec(arr):
    nd = arr.ndim
    return pl.BlockSpec(arr.shape, lambda *_, _nd=nd: (0,) * _nd)


def _bn_affine(bn):
    scale = bn["gamma"] / jnp.sqrt(bn["running_var"] + BN_EPS)
    shift = bn["beta"] - bn["running_mean"] * scale
    c = scale.shape[0]
    return scale.reshape(1, 1, c), shift.reshape(1, 1, c)


def _block_param_arrays(p, k):
    """Flattened per-PreResBlock parameter arrays (order matches the kernel)."""
    cin = p["conv1"]["w"].shape[2]
    med = p["conv1"]["w"].shape[-1]
    cout = p["outconv"]["w"].shape[-1]
    s1, t1 = _bn_affine(p["bn1"])
    s2, t2 = _bn_affine(p["bn2"])
    arrs = [
        s1, t1,
        p["conv1"]["w"].reshape(k * k * cin, med).astype(MXU_DTYPE),
        p["conv1"]["b"].reshape(1, med),
        s2, t2,
        p["conv2"]["w"].reshape(k * k * med, med).astype(MXU_DTYPE),
        p["conv2"]["b"].reshape(1, med),
        p["outconv"]["w"][0, 0].astype(MXU_DTYPE),
        p["outconv"]["b"].reshape(1, cout),
    ]
    if "skipconv" in p:
        arrs += [p["skipconv"]["w"][0, 0].astype(MXU_DTYPE),
                 p["skipconv"]["b"].reshape(1, cout)]
    return arrs


def scale_level_forward(p, f_low, skip_fm, k, d):
    """One decoder level = upsample2x + skip concat + ScaleBlock, one call."""
    n, h, w, cl = f_low.shape
    _, h2, w2, cs = skip_fm.shape
    blocks = list(p["first"]) + [p["last"]]
    block_skips = tuple("skipconv" in bp for bp in blocks)
    cout = p["last"]["outconv"]["w"].shape[-1]

    fused_upsample = (h2 * w2) * (h * w) * 4 <= _UPSAMPLE_MATRIX_BYTES_MAX

    inputs = []
    in_specs = []
    if fused_upsample:
        inputs.append(f_low)
        in_specs.append(pl.BlockSpec((1, h, w, cl), lambda b: (b, 0, 0, 0)))
    else:
        # fallback for very large planes: XLA-level nearest upsample.
        f_up = jnp.repeat(jnp.repeat(f_low, 2, axis=1), 2, axis=2)
        inputs.append(f_up)
        in_specs.append(pl.BlockSpec((1, h2, w2, cl), lambda b: (b, 0, 0, 0)))
    inputs.append(skip_fm)
    in_specs.append(pl.BlockSpec((1, h2, w2, cs), lambda b: (b, 0, 0, 0)))

    if fused_upsample:
        # one-hot gather matrix: output row (ih, iw) <- source row (ih//2, iw//2)
        src = ((jnp.arange(h2)[:, None] // 2) * w
               + (jnp.arange(w2)[None, :] // 2)).reshape(h2 * w2)
        pmat = (src[:, None] == jnp.arange(h * w)[None, :]).astype(MXU_DTYPE)
        inputs.append(pmat)
        in_specs.append(_const_spec(pmat))

    for bp in blocks:
        arrs = _block_param_arrays(bp, k)
        inputs += arrs
        in_specs += [_const_spec(a) for a in arrs]

    kernel = functools.partial(_scale_level_kernel, k=k, d=d,
                               block_skips=block_skips,
                               fused_upsample=fused_upsample)
    return pl.pallas_call(
        kernel,
        out_shape=jax.ShapeDtypeStruct((n, h2, w2, cout), jnp.float32),
        grid=(n,),
        in_specs=in_specs,
        out_specs=pl.BlockSpec((1, h2, w2, cout), lambda b: (b, 0, 0, 0)),
        compiler_params=pltpu.CompilerParams(
            dimension_semantics=("parallel",)),
    )(*inputs)


def _pick_row_tile(m, pref=1024):
    if m <= pref:
        return m
    for cand in (pref, 512, 256, 128, 64, 32, 16, 8):
        if m % cand == 0:
            return cand
    return m


def latent_heads(f_nhwc, mean_p, std_p, lock, key):
    """Fused latent mean/std 1x1 convs + exp + sampling: one matmul, one call."""
    n, h, w, ci = f_nhwc.shape
    cl = mean_p["w"].shape[-1]
    m = n * h * w
    x2d = f_nhwc.reshape(m, ci)
    wcat = jnp.concatenate([mean_p["w"][0, 0], std_p["w"][0, 0]],
                           axis=-1).astype(MXU_DTYPE)            # (ci, 2*cl)
    bcat = jnp.concatenate([mean_p["b"], std_p["b"]]).reshape(1, 2 * cl)

    tm = _pick_row_tile(m)
    grid = (m // tm,)
    x_spec = pl.BlockSpec((tm, ci), lambda i: (i, 0))
    out_specs = pl.BlockSpec((tm, 3 * cl), lambda i: (i, 0))
    out_shape = jax.ShapeDtypeStruct((m, 3 * cl), jnp.float32)
    cparams = pltpu.CompilerParams(dimension_semantics=("parallel",))

    if lock:
        out = pl.pallas_call(
            functools.partial(_latent_locked_kernel, cl=cl),
            out_shape=out_shape, grid=grid,
            in_specs=[x_spec, _const_spec(wcat), _const_spec(bcat)],
            out_specs=out_specs, compiler_params=cparams,
        )(x2d, wcat, bcat)
    else:
        eps = jax.random.normal(key, (m, cl), jnp.float32)
        out = pl.pallas_call(
            functools.partial(_latent_sample_kernel, cl=cl),
            out_shape=out_shape, grid=grid,
            in_specs=[x_spec, pl.BlockSpec((tm, cl), lambda i: (i, 0)),
                      _const_spec(wcat), _const_spec(bcat)],
            out_specs=out_specs, compiler_params=cparams,
        )(x2d, eps, wcat, bcat)

    out = out.reshape(n, h, w, 3 * cl)
    return out[..., :cl], out[..., cl:2 * cl], out[..., 2 * cl:]


# ----------------------------- module forward --------------------------------


def decoder_forward(params, feature_maps, rng=None):
    """Prior path only (post_feature_maps=None), eval mode."""
    cfg = params["config"]
    depth, latent_num = cfg["depth"], cfg["latent_num"]
    locks = cfg["latent_locks"]
    ks, dil = cfg["kernel_size"], cfg["dilation"]

    if rng is None and any(not bool(l) for l in locks[:latent_num]):
        raise ValueError(
            "decoder_forward: rng key required when any latent is unlocked")

    prior_means, prior_stds, prior_latents = [], [], []
    f = feature_maps[0]
    for i in range(depth):
        if i < latent_num:
            key_i = None if locks[i] else jax.random.fold_in(rng, i)
            means, stds, latent = latent_heads(
                f, params["lat_mean"][i], params["lat_std"][i], locks[i], key_i)
            prior_means.append(means)
            prior_stds.append(stds)
            prior_latents.append(latent)
            f = jnp.concatenate([f, latent], axis=-1)  # low-res, cheap
        # upsample + skip concat + whole ScaleBlock: one fused pallas_call.
        f = scale_level_forward(params["dec_blocks"][i], f, feature_maps[i + 1],
                                ks[i + 1], dil[i + 1])
    if latent_num == depth + 1:
        key_i = None if locks[depth] else jax.random.fold_in(rng, depth)
        means, stds, latent = latent_heads(
            f, params["lat_mean"][depth], params["lat_std"][depth],
            locks[depth], key_i)
        f = jnp.concatenate([f, latent], axis=-1)
    infodict = {
        "prior_latents": prior_latents,
        "prior_means": prior_means,
        "prior_stds": prior_stds,
    }
    return f, infodict


# ------------------------- deterministic param init --------------------------


def _init_conv2d(key, ci, co, k):
    # PyTorch Conv2d default init: U(-1/sqrt(fan_in), 1/sqrt(fan_in)); weight
    # stored channels-last as (kh, kw, ci, co).
    kw_, kb_ = jax.random.split(key)
    bound = 1.0 / float((ci * k * k) ** 0.5)
    w = jax.random.uniform(kw_, (k, k, ci, co), jnp.float32, -bound, bound)
    b = jax.random.uniform(kb_, (co,), jnp.float32, -bound, bound)
    return {"w": w, "b": b}


def _init_bn(c):
    return {"gamma": jnp.ones((c,), jnp.float32),
            "beta": jnp.zeros((c,), jnp.float32),
            "running_mean": jnp.zeros((c,), jnp.float32),
            "running_var": jnp.ones((c,), jnp.float32)}


def _init_preres(key, in_ch, out_ch, k):
    has_skip = out_ch is not None
    if out_ch is None:
        out_ch = in_ch
    med = in_ch // 2 if in_ch > 1 else 1
    keys = jax.random.split(key, 4)
    p = {
        "bn1": _init_bn(in_ch),
        "bn2": _init_bn(med),
        "conv1": _init_conv2d(keys[0], in_ch, med, k),
        "conv2": _init_conv2d(keys[1], med, med, k),
        "outconv": _init_conv2d(keys[2], med, out_ch, 1),
    }
    if has_skip:
        p["skipconv"] = _init_conv2d(keys[3], in_ch, out_ch, 1)
    return p


def _init_scale_block(key, in_ch, out_ch, k, sd):
    keys = jax.random.split(key, max(sd, 1))
    first = [_init_preres(keys[j], in_ch, None, k) for j in range(sd - 1)]
    last = _init_preres(keys[-1], in_ch, out_ch, k)
    return {"first": first, "last": last}


def init_decoder(key, chs, latent_num, latent_channels, latent_locks,
                 scale_depth, kernel_size, dilation):
    depth = len(chs) - 1
    nk = 2 * latent_num + depth
    keys = jax.random.split(key, max(nk, 1))
    lat_mean = [_init_conv2d(keys[2 * i], chs[i], latent_channels[i], 1)
                for i in range(latent_num)]
    lat_std = [_init_conv2d(keys[2 * i + 1], chs[i], latent_channels[i], 1)
               for i in range(latent_num)]
    dec_blocks = []
    for i in range(depth):
        in_ch = chs[i] + chs[i + 1] + (latent_channels[i] if i < latent_num else 0)
        dec_blocks.append(
            _init_scale_block(keys[2 * latent_num + i], in_ch, chs[i + 1],
                              kernel_size[i + 1], scale_depth[i + 1])
        )
    return {
        "config": {
            "depth": depth,
            "latent_num": latent_num,
            "latent_locks": latent_locks,
            "kernel_size": kernel_size,
            "dilation": dilation,
        },
        "lat_mean": lat_mean,
        "lat_std": lat_std,
        "dec_blocks": dec_blocks,
    }


# ---------------------------------- main -------------------------------------


if __name__ == "__main__":
    # Decoder config (small, consistent with the PyTorch __init__):
    chs = (8, 8)                 # depth = 1
    latent_num = 1
    latent_channels = (4,)
    latent_locks = (True,)       # locked -> latent = means (deterministic)
    scale_depth = (1, 2)         # decoder block 0 uses scale_depth[1] = 2
    kernel_size = (3, 3)
    dilation = (1, 1)
    B, H0, W0 = 2, 8, 8

    root = jax.random.PRNGKey(0)
    pkey, k0, k1 = jax.random.split(root, 3)
    params = init_decoder(pkey, chs, latent_num, latent_channels, latent_locks,
                          scale_depth, kernel_size, dilation)

    # feature maps in NHWC; NCHW equivalents: (2,8,8,8) and (2,8,16,16).
    feature_maps = [
        jax.random.normal(k0, (B, H0, W0, chs[0]), jnp.float32),
        jax.random.normal(k1, (B, 2 * H0, 2 * W0, chs[1]), jnp.float32),
    ]

    f, info = decoder_forward(params, feature_maps)
    f = jax.block_until_ready(f)
    for arr in info["prior_means"] + info["prior_stds"] + info["prior_latents"]:
        jax.block_until_ready(arr)

    assert f.shape == (B, 2 * H0, 2 * W0, chs[1]), f.shape
    assert bool(jnp.isfinite(f).all())
    print("KERNEL_OK")
</pallas_src>

<mosaic_0001>
module attributes {stable_mosaic.version = 11 : i64} {
  func.func @_latent_locked_kernel(%arg0: i32, %arg1: memref<128x8xf32, #tpu.memory_space<vmem>>, %arg2: memref<8x8xbf16, #tpu.memory_space<vmem>>, %arg3: memref<1x8xf32, #tpu.memory_space<vmem>>, %arg4: memref<128x12xf32, #tpu.memory_space<vmem>>) attributes {dimension_semantics = [#tpu.dimension_semantics<parallel>], iteration_bounds = array<i64: 1>, scalar_prefetch = 0 : i64, scratch_operands = 0 : i64, tpu.core_type = #tpu.core_type<tc>, window_params = [{transform_indices = @transform_0, window_bounds = array<i64: 128, 8>}, {pipeline_mode = #tpu.pipeline_mode<synchronous>, transform_indices = @transform_1, window_bounds = array<i64: 8, 8>}, {pipeline_mode = #tpu.pipeline_mode<synchronous>, transform_indices = @transform_2, window_bounds = array<i64: 1, 8>}, {transform_indices = @transform_3, window_bounds = array<i64: 128, 12>}]} {
    %c0 = arith.constant 0 : index
    %c0_0 = arith.constant 0 : index
    %0 = vector.load %arg1[%c0, %c0_0] : memref<128x8xf32, #tpu.memory_space<vmem>>, vector<128x8xf32>
    %1 = arith.truncf %0 : vector<128x8xf32> to vector<128x8xbf16>
    %c0_1 = arith.constant 0 : index
    %c0_2 = arith.constant 0 : index
    %2 = vector.load %arg2[%c0_1, %c0_2] : memref<8x8xbf16, #tpu.memory_space<vmem>>, vector<8x8xbf16>
    %cst = arith.constant dense<0.000000e+00> : vector<128x8xf32>
    %3 = tpu.matmul %1, %2, %cst {dimension_numbers = #tpu.dot_dimension_numbers<[1], [0], [0], [1], [0, 0, 1, 1], [], []>} : vector<128x8xbf16>, vector<8x8xbf16>, vector<128x8xf32> -> vector<128x8xf32>
    %c0_3 = arith.constant 0 : index
    %c0_4 = arith.constant 0 : index
    %4 = vector.load %arg3[%c0_3, %c0_4] : memref<1x8xf32, #tpu.memory_space<vmem>>, vector<1x8xf32>
    %5 = vector.broadcast %4 : vector<1x8xf32> to vector<128x8xf32>
    %6 = arith.addf %3, %5 : vector<128x8xf32>
    %7 = vector.extract_strided_slice %6 {offsets = [0, 0], sizes = [128, 4], strides = [1, 1]} : vector<128x8xf32> to vector<128x4xf32>
    %8 = vector.extract_strided_slice %6 {offsets = [0, 4], sizes = [128, 4], strides = [1, 1]} : vector<128x8xf32> to vector<128x4xf32>
    %9 = math.exp %8 : vector<128x4xf32>
    %10 = tpu.concatenate %7, %9, %7 in 1 : vector<128x4xf32>, vector<128x4xf32>, vector<128x4xf32> -> vector<128x12xf32>
    %c0_5 = arith.constant 0 : index
    %c0_6 = arith.constant 0 : index
    %11 = vector.load %arg4[%c0_5, %c0_6] : memref<128x12xf32, #tpu.memory_space<vmem>>, vector<128x12xf32>
    tpu.vector_store %arg4[%c0_5, %c0_6], %10 {strides = array<i32>} : memref<128x12xf32, #tpu.memory_space<vmem>>, vector<128x12xf32>,
    return
  }
  func.func @transform_0(%arg0: i32) -> (i32, i32) {
    %c0_i32 = arith.constant 0 : i32
    %c0_i32_0 = arith.constant 0 : i32
    return %arg0, %c0_i32 : i32, i32
  }
  func.func @transform_1(%arg0: i32) -> (i32, i32) {
    %c0_i32 = arith.constant 0 : i32
    %c0_i32_0 = arith.constant 0 : i32
    %c0_i32_1 = arith.constant 0 : i32
    return %c0_i32, %c0_i32_0 : i32, i32
  }
  func.func @transform_2(%arg0: i32) -> (i32, i32) {
    %c0_i32 = arith.constant 0 : i32
    %c0_i32_0 = arith.constant 0 : i32
    %c0_i32_1 = arith.constant 0 : i32
    return %c0_i32, %c0_i32_0 : i32, i32
  }
  func.func @transform_3(%arg0: i32) -> (i32, i32) {
    %c0_i32 = arith.constant 0 : i32
    %c0_i32_0 = arith.constant 0 : i32
    return %arg0, %c0_i32 : i32, i32
  }
}

</mosaic_0001>

<bundles_post_ra>
// kernel: tpu_custom_call.1
= control target key start
LH: loop header
LB: loop body
LE: loop exit
PB: predicated region body
PF: predicated region fallthrough
CT: control target
= control target key end

     0   :  { %vm72_vm0 = vcmask 1043456   ;;  %vm47_vm1 = vcmask 64512   ;;  %vm269_vm2 = vcmask 31744   ;;  %vm302_vm3 = vcmask 97280   ;;  %s671_s1 = inlined_call_operand.vmem [shape: bf16[8,8], index: 1, kind: input, shape index: {}]   ;;  %s672_s0 = inlined_call_operand.vmem [shape: f32[128,8], index: 0, kind: input, shape index: {}]   ;;  %s673_s2 = inlined_call_operand.vmem [shape: f32[1,8], index: 2, kind: input, shape index: {}]   ;;  %s674_s3 = inlined_call_operand.vmem [shape: f32[128,12], index: 3, kind: output, shape index: {}]  }
   0x1   :  { %v39_v0 = vld [vmem:[%s671_s1] sm:$0xf]  ;;  %v16_v2 = vld [vmem:[%s672_s0 + $0x8] sm:$0xff]  ;;  %v17_v7 = vld [vmem:[%s672_s0 + $0x10] sm:$0xff] }
   0x2   :  { %v15_v1 = vld [vmem:[%s672_s0] sm:$0xff]  ;;  %361 = vmatprep.subr.msk.bf16.mxu0 %vm72_vm0, %v39_v0  ;;  %362 = vmatprep.subr.msk.bf16.mxu1 %vm72_vm0, %v39_v0  ;;  %v74_v3 = vsel %vm72_vm0, %v39_v0, 0  ;;  %v24_v6 = vld [vmem:[%s672_s0 + $0x48] sm:$0xff]  ;;  %v18_v9 = vld [vmem:[%s672_s0 + $0x18] sm:$0xff] }
   0x3   :  { %v31_v4 = vpack.c.bf16 %v16_v2, %v15_v1  ;;  %v23_v5 = vld [vmem:[%s672_s0 + $0x40] sm:$0xff]  ;;  %342 = vmatpush3.bf16.msra.mxu0 %v74_v3  ;;  %360 = vmatpush3.bf16.msra.mxu1 %v74_v3  ;;  %v25_v10 = vld [vmem:[%s672_s0 + $0x50] sm:$0xff]  ;;  %v26_v11 = vld [vmem:[%s672_s0 + $0x58] sm:$0xff]  ;;  %v32_v12 = vpack.c.bf16 %v18_v9, %v17_v7 }
   0x4   :  { %v35_v8 = vpack.c.bf16 %v24_v6, %v23_v5  ;;  %v36_v13 = vpack.c.bf16 %v26_v11, %v25_v10  ;;  %v19_v14 = vld [vmem:[%s672_s0 + $0x20] sm:$0xff]  ;;  %v20_v15 = vld [vmem:[%s672_s0 + $0x28] sm:$0xff]  ;;  %v21_v20 = vld [vmem:[%s672_s0 + $0x30] sm:$0xff] }
   0x5   :  { %343 = vmatprep.mubr.msk.bf16.mxu0 %vm47_vm1, %v31_v4  ;;  %v27_v16 = vld [vmem:[%s672_s0 + $0x60] sm:$0xff]  ;;  %v33_v17 = vpack.c.bf16 %v20_v15, %v19_v14  ;;  %v28_v18 = vld [vmem:[%s672_s0 + $0x68] sm:$0xff]  ;;  %v22_v21 = vld [vmem:[%s672_s0 + $0x38] sm:$0xff] }
   0x6   :  { %351 = vmatprep.mubr.msk.bf16.mxu1 %vm47_vm1, %v35_v8  ;;  %344 = vmatmul.mubr.msk.bf16.vlgmr.msra.gmra.mrb[0].mxu0 %vm47_vm1, %v32_v12  ;;  %v37_v19 = vpack.c.bf16 %v28_v18, %v27_v16  ;;  %v29_v22 = vld [vmem:[%s672_s0 + $0x70] sm:$0xff]  ;;  %v30_v23 = vld [vmem:[%s672_s0 + $0x78] sm:$0xff]  ;;  %v34_v24 = vpack.c.bf16 %v22_v21, %v21_v20  ;;  %v323_v26 = vld [vmem:[%s673_s2] ss:$0 sm:$0xff]  ;;  %s396_s0 = smov 8  }
   0x7   :  { %352 = vmatmul.mubr.msk.bf16.vlgmr.msra.gmra.mrb[0].mxu1 %vm47_vm1, %v36_v13  ;;  %347 = vmatprep.mubr.msk.bf16.mxu0 %vm47_vm1, %v33_v17  ;;  %v38_v25 = vpack.c.bf16 %v30_v23, %v29_v22 }
   0x8   :  { %355 = vmatprep.mubr.msk.bf16.mxu1 %vm47_vm1, %v37_v19 }
   0xe   :  { %348 = vmatmul.mubr.msk.bf16.gmra.mrb[4].mxu0 %vm47_vm1, %v34_v24 }
   0xf   :  { %356 = vmatmul.mubr.msk.bf16.gmra.mrb[4].mxu1 %vm47_vm1, %v38_v25 }
  0xd9   :  { %v345_v27 = vpop.f32.mrb[0].mxu0 }
  0xda   :  { %v353_v28 = vpop.f32.mrb[0].mxu1  ;;  %v479_v29 = vadd.f32 %v345_v27, %v323_v26  ;;  %v110_v31 = vpop.f32.mrb[1].mxu0 }
  0xdb   :  { %v481_v30 = vadd.f32 %v353_v28, %v323_v26  ;;  %v142_v32 = vpop.f32.mrb[1].mxu1  ;;  %v346_v33 = vpop.f32.mrb[2].mxu0  ;;  %v487_v37 = vadd.f32 %v323_v26, %v110_v31 }
  0xdc   :  { %v354_v34 = vpop.f32.mrb[2].mxu1  ;;  %225 = vrot.lane.b32.xlu1 %v479_v29, %s396_s0  ;;  %v113_v36 = vpop.f32.mrb[3].mxu0  ;;  %v489_v38 = vadd.f32 %v346_v33, %v323_v26  ;;  %v495_v41 = vadd.f32 %v323_v26, %v142_v32  ;;  %v177_v59 = vmul.f32 1.442695, %v479_v29 }
  0xdd   :  { %241 = vrot.lane.b32.xlu0 %v481_v30, %s396_s0  ;;  %v145_v35 = vpop.f32.mrb[3].mxu1  ;;  %v497_v42 = vadd.f32 %v354_v34, %v323_v26  ;;  %v505_v50 = vadd.f32 %v323_v26, %v113_v36  ;;  %v193_v60 = vmul.f32 1.442695, %v481_v30  ;;  %v173_v61 = vmul.f32 1.442695, %v487_v37 }
  0xde   :  { %v503_v49 = vadd.f32 %v323_v26, %v145_v35  ;;  %364 = vpow2.f32 %v177_v59  ;;  %v179_v62 = vmul.f32 1.442695, %v489_v38  ;;  %v189_v63 = vmul.f32 1.442695, %v495_v41 }
  0xdf   :  { %366 = vpow2.f32 %v193_v60  ;;  %v195_v0 = vmul.f32 1.442695, %v497_v42  ;;  %v175_v2 = vmul.f32 1.442695, %v505_v50 }
  0xe0   :  { %227 = vrot.lane.b32.xlu1 %v489_v38, %s396_s0  ;;  %368 = vpow2.f32 %v173_v61  ;;  %v191_v1 = vmul.f32 1.442695, %v503_v49 }
  0xe1   :  { %221 = vrot.lane.b32.xlu0 %v487_v37, %s396_s0  ;;  %v349_v39 = vpop.f32.mrb[4].mxu0  ;;  %370 = vpow2.f32 %v179_v62 }
  0xe2   :  { %v357_v40 = vpop.f32.mrb[4].mxu1  ;;  %v126_v43 = vpop.f32.mrb[5].mxu0  ;;  %v511_v51 = vadd.f32 %v349_v39, %v323_v26  ;;  %372 = vpow2.f32 %v189_v63 }
  0xe3   :  { %v158_v44 = vpop.f32.mrb[5].mxu1  ;;  %v350_v45 = vpop.f32.mrb[6].mxu0  ;;  %v519_v53 = vadd.f32 %v323_v26, %v126_v43  ;;  %v535_v57 = vadd.f32 %v357_v40, %v323_v26  ;;  %374 = vpow2.f32 %v195_v0 }
  0xe4   :  { %v358_v46 = vpop.f32.mrb[6].mxu1  ;;  %243 = vrot.lane.b32.xlu1 %v497_v42, %s396_s0  ;;  %v129_v48 = vpop.f32.mrb[7].mxu0  ;;  %v513_v52 = vadd.f32 %v350_v45, %v323_v26  ;;  %v527_v55 = vadd.f32 %v323_v26, %v158_v44  ;;  %376 = vpow2.f32 %v191_v1  ;;  %v185_v5 = vmul.f32 1.442695, %v511_v51 }
  0xe5   :  { %v161_v47 = vpop.f32.mrb[7].mxu1  ;;  %237 = vrot.lane.b32.xlu0 %v495_v41, %s396_s0  ;;  %v521_v54 = vadd.f32 %v323_v26, %v129_v48  ;;  %v537_v58 = vadd.f32 %v358_v46, %v323_v26  ;;  %378 = vpow2.f32 %v175_v2  ;;  %v181_v15 = vmul.f32 1.442695, %v519_v53 }
  0xe6   :  { %v529_v56 = vadd.f32 %v323_v26, %v161_v47  ;;  %v187_v6 = vmul.f32 1.442695, %v513_v52  ;;  %380 = vpow2.f32 %v185_v5  ;;  %v197_v25 = vmul.f32 1.442695, %v527_v55 }
  0xe7   :  { %v183_v16 = vmul.f32 1.442695, %v521_v54  ;;  %v201_v35 = vmul.f32 1.442695, %v535_v57  ;;  %v203_v36 = vmul.f32 1.442695, %v537_v58 }
  0xe8   :  { %239 = vrot.lane.b32.xlu1 %v503_v49, %s396_s0  ;;  %v365_v3 = vpop.eup %364  ;;  %382 = vpow2.f32 %v187_v6  ;;  %v199_v26 = vmul.f32 1.442695, %v529_v56 }
  0xe9   :  { %223 = vrot.lane.b32.xlu0 %v505_v50, %s396_s0  ;;  %v367_v4 = vpop.eup %366  ;;  %v272_v11 = vsel %vm269_vm2, %v479_v29, %v365_v3  ;;  %384 = vpow2.f32 %v181_v15 }
  0xea   :  { %v369_v7 = vpop.eup %368  ;;  %v280_v9 = vsel %vm269_vm2, %v481_v30, %v367_v4  ;;  %386 = vpow2.f32 %v183_v16 }
  0xeb   :  { %v371_v12 = vpop.eup %370  ;;  %v270_v21 = vsel %vm269_vm2, %v487_v37, %v369_v7  ;;  %388 = vpow2.f32 %v197_v25 }
  0xec   :  { %235 = vrot.lane.b32.xlu1 %v513_v52, %s396_s0  ;;  %v373_v17 = vpop.eup %372  ;;  %v273_v19 = vsel %vm269_vm2, %v489_v38, %v371_v12  ;;  %390 = vpow2.f32 %v199_v26 }
  0xed   :  { %233 = vrot.lane.b32.xlu0 %v511_v51, %s396_s0  ;;  %v375_v22 = vpop.eup %374  ;;  %v278_v30 = vsel %vm269_vm2, %v495_v41, %v373_v17  ;;  %392 = vpow2.f32 %v201_v35 }
  0xee   :  { %v377_v27 = vpop.eup %376  ;;  %v281_v28 = vsel %vm269_vm2, %v497_v42, %v375_v22  ;;  %394 = vpow2.f32 %v203_v36 }
  0xef   :  { %v379_v32 = vpop.eup %378  ;;  %v279_v38 = vsel %vm269_vm2, %v503_v49, %v377_v27 }
  0xf0   :  { %231 = vrot.lane.b32.xlu1 %v521_v54, %s396_s0  ;;  %v381_v37 = vpop.eup %380  ;;  %v271_v40 = vsel %vm269_vm2, %v505_v50, %v379_v32 }
  0xf1   :  { %229 = vrot.lane.b32.xlu0 %v519_v53, %s396_s0  ;;  %v276_v48 = vsel %vm269_vm2, %v511_v51, %v381_v37 }
  0xf2   :  { %v383_v42 = vpop.eup %382 }
  0xf3   :  { %v385_v45 = vpop.eup %384  ;;  %v277_v47 = vsel %vm269_vm2, %v513_v52, %v383_v42 }
  0xf4   :  { %247 = vrot.lane.b32.xlu1 %v529_v56, %s396_s0  ;;  %v387_v50 = vpop.eup %386  ;;  %v274_v62 = vsel %vm269_vm2, %v519_v53, %v385_v45 }
  0xf5   :  { %245 = vrot.lane.b32.xlu0 %v527_v55, %s396_s0  ;;  %v389_v52 = vpop.eup %388  ;;  %v275_v51 = vsel %vm269_vm2, %v521_v54, %v387_v50 }
  0xf6   :  { %v391_v0 = vpop.eup %390  ;;  %v282_v4 = vsel %vm269_vm2, %v527_v55, %v389_v52 }
  0xf7   :  { %v393_v54 = vpop.eup %392  ;;  %v283_v53 = vsel %vm269_vm2, %v529_v56, %v391_v0 }
  0xf8   :  { %251 = vrot.lane.b32.xlu1 %v537_v58, %s396_s0  ;;  %v395_v6 = vpop.eup %394 }
  0xf9   :  { %249 = vrot.lane.b32.xlu0 %v535_v57, %s396_s0  ;;  %v285_v56 = vsel %vm269_vm2, %v537_v58, %v395_v6 }
 0x14e   :  { %v226_v10 = vpop.permute.xlu1 %225 }
 0x14f   :  { %v242_v8 = vpop.permute.xlu0 %241  ;;  %v288_v14 = vsel %vm47_vm1, %v272_v11, %v226_v10 }
 0x150   :  { %v296_v13 = vsel %vm47_vm1, %v280_v9, %v242_v8  ;;  %305 = vst.msk [vmem:[%s674_s3 + $0x10] sm:$0xff] %vm302_vm3, %v288_v14  ;;  %v284_v9 = vsel %vm269_vm2, %v535_v57, %v393_v54 }
 0x151   :  { %313 = vst.msk [vmem:[%s674_s3 + $0x50] sm:$0xff] %vm302_vm3, %v296_v13 }
 0x152   :  { %v228_v18 = vpop.permute.xlu1 %227 }
 0x153   :  { %v222_v20 = vpop.permute.xlu0 %221  ;;  %v289_v23 = vsel %vm47_vm1, %v273_v19, %v228_v18 }
 0x154   :  { %v286_v24 = vsel %vm47_vm1, %v270_v21, %v222_v20  ;;  %306 = vst.msk [vmem:[%s674_s3 + $0x18] sm:$0xff] %vm302_vm3, %v289_v23 }
 0x155   :  { %303 = vst.msk [vmem:[%s674_s3] sm:$0xff] %vm302_vm3, %v286_v24 }
 0x156   :  { %v244_v29 = vpop.permute.xlu1 %243 }
 0x157   :  { %v238_v31 = vpop.permute.xlu0 %237  ;;  %v297_v33 = vsel %vm47_vm1, %v281_v28, %v244_v29 }
 0x158   :  { %v294_v34 = vsel %vm47_vm1, %v278_v30, %v238_v31  ;;  %314 = vst.msk [vmem:[%s674_s3 + $0x58] sm:$0xff] %vm302_vm3, %v297_v33 }
 0x159   :  { %311 = vst.msk [vmem:[%s674_s3 + $0x40] sm:$0xff] %vm302_vm3, %v294_v34 }
 0x15a   :  { %v240_v39 = vpop.permute.xlu1 %239 }
 0x15b   :  { %v224_v41 = vpop.permute.xlu0 %223  ;;  %v295_v43 = vsel %vm47_vm1, %v279_v38, %v240_v39 }
 0x15c   :  { %v287_v44 = vsel %vm47_vm1, %v271_v40, %v224_v41  ;;  %312 = vst.msk [vmem:[%s674_s3 + $0x48] sm:$0xff] %vm302_vm3, %v295_v43 }
 0x15d   :  { %304 = vst.msk [vmem:[%s674_s3 + $0x8] sm:$0xff] %vm302_vm3, %v287_v44 }
 0x15e   :  { %v236_v46 = vpop.permute.xlu1 %235 }
 0x15f   :  { %v234_v49 = vpop.permute.xlu0 %233  ;;  %v293_v59 = vsel %vm47_vm1, %v277_v47, %v236_v46 }
 0x160   :  { %v292_v60 = vsel %vm47_vm1, %v276_v48, %v234_v49  ;;  %310 = vst.msk [vmem:[%s674_s3 + $0x38] sm:$0xff] %vm302_vm3, %v293_v59 }
 0x161   :  { %309 = vst.msk [vmem:[%s674_s3 + $0x30] sm:$0xff] %vm302_vm3, %v292_v60 }
 0x162   :  { %v232_v61 = vpop.permute.xlu1 %231 }
 0x163   :  { %v230_v63 = vpop.permute.xlu0 %229  ;;  %v291_v1 = vsel %vm47_vm1, %v275_v51, %v232_v61 }
 0x164   :  { %v290_v2 = vsel %vm47_vm1, %v274_v62, %v230_v63  ;;  %308 = vst.msk [vmem:[%s674_s3 + $0x28] sm:$0xff] %vm302_vm3, %v291_v1 }
 0x165   :  { %307 = vst.msk [vmem:[%s674_s3 + $0x20] sm:$0xff] %vm302_vm3, %v290_v2 }
 0x166   :  { %v248_v3 = vpop.permute.xlu1 %247 }
 0x167   :  { %v246_v5 = vpop.permute.xlu0 %245  ;;  %v299_v7 = vsel %vm47_vm1, %v283_v53, %v248_v3 }
 0x168   :  { %v298_v8 = vsel %vm47_vm1, %v282_v4, %v246_v5  ;;  %316 = vst.msk [vmem:[%s674_s3 + $0x68] sm:$0xff] %vm302_vm3, %v299_v7 }
 0x169   :  { %315 = vst.msk [vmem:[%s674_s3 + $0x60] sm:$0xff] %vm302_vm3, %v298_v8 }
 0x16a   :  { %v252_v55 = vpop.permute.xlu1 %251 }
 0x16b   :  { %v250_v10 = vpop.permute.xlu0 %249  ;;  %v301_v11 = vsel %vm47_vm1, %v285_v56, %v252_v55 }
 0x16c   :  { %v300_v12 = vsel %vm47_vm1, %v284_v9, %v250_v10  ;;  %318 = vst.msk [vmem:[%s674_s3 + $0x78] sm:$0xff] %vm302_vm3, %v301_v11 }
 0x16d   :  { %317 = vst.msk [vmem:[%s674_s3 + $0x70] sm:$0xff] %vm302_vm3, %v300_v12 }

</bundles_post_ra>
